<compile_context>
chip_gen: v7x
topology: tpu7x:2x2x1
jax: 0.10.0
libtpu: 0.0.40
codegen_flags: <defaults>
</compile_context>

<pallas_src>
import jax
import jax.numpy as jnp
from jax.experimental import pallas as pl
from jax.experimental.pallas import tpu as pltpu


def _occlude_kernel(x_ref, m_ref, o_ref):
    # x_ref: (1, c_blk, gh_blk, P, W)  tile of the NCHW input (H split into (gh, P))
    # m_ref: (1, 1,     gh_blk, 1, W)  keep mask: 1.0 = keep patch, 0.0 = drop patch
    # The mask broadcasts over the channel dim and the P pixel rows of each patch.
    x = x_ref[...]
    o_ref[...] = jnp.where(m_ref[...] > 0, x, jnp.zeros_like(x))


def _largest_divisor_leq(n, cap):
    cap = max(1, min(n, cap))
    for d in range(cap, 0, -1):
        if n % d == 0:
            return d
    return 1


def patch_embed_occlude(x, key, patch_size=4, p=0.5):
    """JAX/Pallas equivalent of Patch_Embed_Occlude.forward.

    x:   (B, C, H, W) float array (NCHW, matching the PyTorch module).
    key: jax.random key for the per-patch Bernoulli(p) drop sampling.
    """
    B, C, H, W = x.shape
    P = patch_size
    if H % P != 0 or W % P != 0:
        raise ValueError("H and W must be divisible by patch_size")
    gh, gw = H // P, W // P

    # Per-(b, h-patch, w-patch) Bernoulli(p) drop decision (whole patch, all channels).
    # TODO(synk): RNG stream differs from torch.rand, so the exact drop pattern will
    # not match the PyTorch module bit-for-bit (the distribution is identical).
    drop = jax.random.bernoulli(key, p, (B, gh, gw))
    keep = (~drop).astype(x.dtype)                       # (B, gh, gw): 1=keep, 0=drop
    # Expand along width only (height stays patch-granular; broadcast in-kernel).
    keep_w = jnp.repeat(keep, P, axis=2)                 # (B, gh, W)
    keep_w = keep_w.reshape(B, 1, gh, 1, W)              # broadcast-ready, tiny

    # Free (bitcast) reshape of NCHW: split H -> (gh, P).  No transposes, no copies.
    x5 = x.reshape(B, C, gh, P, W)

    # Block sizing: aim for ~2 MiB of (VMEM-padded) x per block so that
    # 2x input + 2x output double-buffered blocks stay well under the 32 MiB
    # scoped VMEM limit on every generation (v5e/v6e/v7x).
    elt = jnp.dtype(x.dtype).itemsize
    pad8 = lambda n: -(-n // 8) * 8
    pad128 = lambda n: -(-n // 128) * 128
    unit = pad8(P) * pad128(W) * elt                     # one gh-row of one channel
    budget = 2 * 1024 * 1024
    gh_blk = _largest_divisor_leq(gh, max(1, budget // unit))
    c_blk = _largest_divisor_leq(C, max(1, budget // (gh_blk * unit)))

    grid = (B, C // c_blk, gh // gh_blk)

    out5 = pl.pallas_call(
        _occlude_kernel,
        out_shape=jax.ShapeDtypeStruct(x5.shape, x5.dtype),
        grid_spec=pltpu.PrefetchScalarGridSpec(
            num_scalar_prefetch=0,
            grid=grid,
            in_specs=[
                pl.BlockSpec((1, c_blk, gh_blk, P, W),
                             lambda b, c, g: (b, c, g, 0, 0)),
                pl.BlockSpec((1, 1, gh_blk, 1, W),
                             lambda b, c, g: (b, 0, g, 0, 0)),
            ],
            out_specs=pl.BlockSpec((1, c_blk, gh_blk, P, W),
                                   lambda b, c, g: (b, c, g, 0, 0)),
        ),
        compiler_params=pltpu.CompilerParams(
            dimension_semantics=("parallel", "parallel", "parallel"),
            vmem_limit_bytes=32 * 1024 * 1024,
        ),
        input_output_aliases={0: 0},
    )(x5, keep_w)

    # Free reshape back to NCHW (merge (gh, P) -> H).
    return out5.reshape(B, C, H, W)


if __name__ == "__main__":
    # Small shapes consistent with the module: B=2, C=4, 16x16 image, patch_size=4.
    key = jax.random.PRNGKey(0)
    k_x, k_mask = jax.random.split(key)

    B, C, H, W = 2, 4, 16, 16
    patch_size = 4
    p = 0.5

    x = jax.random.normal(k_x, (B, C, H, W), dtype=jnp.float32)

    out = patch_embed_occlude(x, k_mask, patch_size=patch_size, p=p)
    out = jax.block_until_ready(out)

    # Pure-JAX reference using the same deterministic drop mask.
    gh, gw = H // patch_size, W // patch_size
    drop = jax.random.bernoulli(k_mask, p, (B, gh, gw))
    keep = (~drop).astype(x.dtype)                             # (B, gh, gw)
    keep_px = jnp.repeat(jnp.repeat(keep, patch_size, axis=1), # (B, H, W)
                         patch_size, axis=2)
    ref = jnp.where(keep_px[:, None, :, :] > 0, x, jnp.zeros_like(x))

    assert out.shape == x.shape
    assert jnp.allclose(out, ref, atol=1e-6), "mismatch vs reference"

    print("KERNEL_OK")
</pallas_src>

<mosaic_0001>
module attributes {stable_mosaic.version = 11 : i64} {
  func.func @_occlude_kernel(%arg0: i32, %arg1: i32, %arg2: i32, %arg3: memref<1x4x4x4x16xf32, #tpu.memory_space<vmem>>, %arg4: memref<1x1x4x1x16xf32, #tpu.memory_space<vmem>>, %arg5: memref<1x4x4x4x16xf32, #tpu.memory_space<vmem>>) attributes {dimension_semantics = [#tpu.dimension_semantics<parallel>, #tpu.dimension_semantics<parallel>, #tpu.dimension_semantics<parallel>], iteration_bounds = array<i64: 2, 1, 1>, scalar_prefetch = 0 : i64, scratch_operands = 0 : i64, tpu.core_type = #tpu.core_type<tc>, window_params = [{transform_indices = @transform_0, window_bounds = array<i64: 1, 4, 4, 4, 16>}, {transform_indices = @transform_1, window_bounds = array<i64: 1, 1, 4, 1, 16>}, {transform_indices = @transform_2, window_bounds = array<i64: 1, 4, 4, 4, 16>}]} {
    %c0 = arith.constant 0 : index
    %c0_0 = arith.constant 0 : index
    %c0_1 = arith.constant 0 : index
    %c0_2 = arith.constant 0 : index
    %c0_3 = arith.constant 0 : index
    %0 = vector.load %arg3[%c0, %c0_0, %c0_1, %c0_2, %c0_3] : memref<1x4x4x4x16xf32, #tpu.memory_space<vmem>>, vector<1x4x4x4x16xf32>
    %c0_4 = arith.constant 0 : index
    %c0_5 = arith.constant 0 : index
    %c0_6 = arith.constant 0 : index
    %c0_7 = arith.constant 0 : index
    %c0_8 = arith.constant 0 : index
    %1 = vector.load %arg4[%c0_4, %c0_5, %c0_6, %c0_7, %c0_8] : memref<1x1x4x1x16xf32, #tpu.memory_space<vmem>>, vector<1x1x4x1x16xf32>
    %cst = arith.constant 0.000000e+00 : f32
    %2 = vector.broadcast %cst : f32 to vector<1x1x4x1x16xf32>
    %3 = arith.cmpf ogt, %1, %2 : vector<1x1x4x1x16xf32>
    %cst_9 = arith.constant 0.000000e+00 : f32
    %4 = vector.broadcast %cst_9 : f32 to vector<1x4x4x4x16xf32>
    %5 = vector.shape_cast %3 : vector<1x1x4x1x16xi1> to vector<1x1x4x1x16xi1>
    %6 = vector.broadcast %5 : vector<1x1x4x1x16xi1> to vector<1x4x4x4x16xi1>
    %7 = arith.select %6, %0, %4 : vector<1x4x4x4x16xi1>, vector<1x4x4x4x16xf32>
    %c0_10 = arith.constant 0 : index
    %c0_11 = arith.constant 0 : index
    %c0_12 = arith.constant 0 : index
    %c0_13 = arith.constant 0 : index
    %c0_14 = arith.constant 0 : index
    %8 = vector.load %arg5[%c0_10, %c0_11, %c0_12, %c0_13, %c0_14] : memref<1x4x4x4x16xf32, #tpu.memory_space<vmem>>, vector<1x4x4x4x16xf32>
    tpu.vector_store %arg5[%c0_10, %c0_11, %c0_12, %c0_13, %c0_14], %7 {strides = array<i32>} : memref<1x4x4x4x16xf32, #tpu.memory_space<vmem>>, vector<1x4x4x4x16xf32>,
    return
  }
  func.func @transform_0(%arg0: i32, %arg1: i32, %arg2: i32) -> (i32, i32, i32, i32, i32) {
    %c0_i32 = arith.constant 0 : i32
    %c0_i32_0 = arith.constant 0 : i32
    %c0_i32_1 = arith.constant 0 : i32
    return %arg0, %arg1, %arg2, %c0_i32, %c0_i32_0 : i32, i32, i32, i32, i32
  }
  func.func @transform_1(%arg0: i32, %arg1: i32, %arg2: i32) -> (i32, i32, i32, i32, i32) {
    %c0_i32 = arith.constant 0 : i32
    %c0_i32_0 = arith.constant 0 : i32
    %c0_i32_1 = arith.constant 0 : i32
    %c0_i32_2 = arith.constant 0 : i32
    return %arg0, %c0_i32, %arg2, %c0_i32_0, %c0_i32_1 : i32, i32, i32, i32, i32
  }
  func.func @transform_2(%arg0: i32, %arg1: i32, %arg2: i32) -> (i32, i32, i32, i32, i32) {
    %c0_i32 = arith.constant 0 : i32
    %c0_i32_0 = arith.constant 0 : i32
    %c0_i32_1 = arith.constant 0 : i32
    return %arg0, %arg1, %arg2, %c0_i32, %c0_i32_0 : i32, i32, i32, i32, i32
  }
}

</mosaic_0001>

<bundles_post_ra>
// kernel: tpu_custom_call.1
= control target key start
LH: loop header
LB: loop body
LE: loop exit
PB: predicated region body
PF: predicated region fallthrough
CT: control target
= control target key end

     0   :  { %7 = vsyncpa [#allocation3], 0  ;;  %s950_s0 = inlined_call_operand.hbm [shape: f32[2,4,4,4,16], index: 0, kind: input, shape index: {}, may-alias: {0,2}]   ;;  %s951_s1 = inlined_call_operand.vmem [shape: f32[2,1,4,1,16], index: 1, kind: input, shape index: {}]   ;;  %s952_s2 = inlined_call_operand.hbm [shape: f32[2,4,4,4,16], index: 2, kind: output, shape index: {}, may-alias: {0,2}]  }
   0x1   :  { %9 = vsyncpa [#allocation3 + $0x1], 0 }
   0x2   :  { %10 = vsyncpa [#allocation4], 0 }
   0x3   :  { %12 = vsyncpa [#allocation4 + $0x1], 0  ;;  %s661_s9 = smov 0   ;;  %s663_s10 = smov 0  }
   0x4   :  { %s665_s11 = smov 0   ;;  %s667_s12 = smov 0  }
   0x5   :  { %s669_s13 = smov 0   ;;  %s671_s14 = smov 0  }
   0x6 LB: > { %s440_s15 = sadd.s32 4294967295, %s637_s14   ;;  %s441_s16 = sadd.s32 4294967294, %s637_s14   ;;  %s637_s14 = sphi %s671_s14, %s18_s14   ;;  %s633_s13 = sphi %s669_s13, %s975_s13   ;;  %s629_s12 = sphi %s667_s12, %s974_s12   ;;  %s625_s11 = sphi %s665_s11, %s973_s11   ;;  %s621_s10 = sphi %s663_s10, %s972_s10   ;;  %s617_s9 = sphi %s661_s9, %s971_s9  }
   0x7   : > { %s37_s17 = sadd.s32 1, %s633_s13  ;;  %s48_s18 = sadd.s32 1, %s625_s11 }
   0x8   : > { %p39_p0 = scmp.ge.s32.totalorder %s37_s17, 2  ;;  %p55_p1 = scmp.ne.s32.totalorder %s625_s11, %s621_s10 }
   0x9   : > { %p56_p2 = scmp.eq.s32.totalorder %s637_s14, 0  ;;  %p61_p3 = scmp.ne.s32.totalorder %s621_s10, %s617_s9 }
   0xa   : > { %s977_s17 = smov (%p39_p0, %s37_s17), 0  ;;  %p62_p5 = scmp.eq.s32.totalorder %s440_s15, 0 }
   0xb   : > { %p702_p4 = por %p56_p2, %p55_p1  ;;  %s41_s20 = ssub.s32 %s633_s13, %s977_s17 }
   0xc   : > { %p117_p6 = scmp.eq.s32.totalorder %s440_s15, 1  ;;  %p46_p7 = scmp.eq.s32.totalorder %s41_s20, 0 }
   0xd   : > { %p708_p8 = por %p62_p5, %p61_p3  ;;  %p123_p10 = scmp.eq.s32.totalorder %s441_s16, 1 }
   0xe   : > { %p712_p9 = por %p117_p6, %p55_p1  ;;  %p470_p13 = scmp.lt.s32.totalorder %s637_s14, 2 }
   0xf   : > { %s717_s23 = scalar_select %p46_p7, %s625_s11, %s48_s18  }
  0x10   : > { %s956_s22 = scalar_select %p712_p9, 1, 0 }
  0x11   : > { %p719_p11 = por %p123_p10, %p61_p3  ;;  %s143_s25 = sand.u32 1, %s625_s11  }
  0x12   : > { %s444_s26 = sshll.u32 %s143_s25, 6  ;;  %s456_s27 = sshll.u32 %s633_s13, 10 }
  0x13   : > { %s957_s24 = scalar_select %p719_p11, 1, 0 }
  0x14   : > { %s730_s30 = scalar_lea.hbm %s950_s0, %s456_s27  ;;  %s147_s3 = scalar_lea.vmem [#allocation2], %s444_s26 }
  0x15   : > { %s159_s4 = sshll.u32 %s147_s3, 4  ;;  %p736_p0 = pnand %p470_p13, %p702_p4  ;;  %s732_s4 = int_to_ptr.vmem [resolvable:$true] %s159_s4 }
  0x16   : > { %s741_s6 = scalar_lea.sflag [#allocation3], %s143_s25  ;;  %s525_s7 = scalar_lea.hbm %s730_s30, 1024 }
  0x17   : > { %p526_p2 = scmp.ne.s32.totalorder %s730_s30, %s525_s7  ;;  %p527_p3 = pneg %p736_p0 }
  0x18   : > { %s530_s16 = scalar_lea.hbm %s950_s0, 2048  ;;  %p531_p4 = scmp.lt.u32.totalorder %s730_s30, %s950_s0 }
  0x19   : > { %p528_p5 = pnand %p527_p3, %p526_p2  ;;  %p532_p7 = scmp.lt.u32.totalorder %s530_s16, %s525_s7 }
  0x1a   : > { %p534_p13 = scmp.lt.u32.totalorder %s525_s7, %s730_s30 }
  0x1b   : > { %p529_p6 = pneg %p528_p5  ;;  %p533_p10 = por %p532_p7, %p531_p4 }
  0x1d   : > { %p535_p12 = por %p534_p13, %p533_p10 }
  0x1f   : > { %p536_p1 = pnand %p535_p12, %p529_p6 }
  0x21   : > { %539 = shalt.err (!%p536_p1)
}
  0x22   : > { %s540_s20 = scalar_lea.vmem %s732_s4, 1024  ;;  %s639_s25 = smov [#allocation2]  }
  0x23   : > { %p541_p2 = scmp.ne.s32.totalorder %s732_s4, %s540_s20  ;;  %s545_s26 = sshll.u32 %s639_s25, 4  ;;  %s546_s26 = int_to_ptr.vmem [resolvable:$false] %s545_s26 }
  0x24   : > { %s547_s27 = scalar_lea.vmem %s546_s26, 2048  ;;  %p548_p9 = scmp.lt.s32.totalorder %s732_s4, %s546_s26 }
  0x25   : > { %p543_p5 = pnand %p541_p2, %p527_p3  ;;  %p549_p4 = scmp.lt.s32.totalorder %s547_s27, %s540_s20 }
  0x27   : > { %p544_p11 = pneg %p543_p5  ;;  %p550_p7 = por %p549_p4, %p548_p9 }
  0x29   : > { %p551_p10 = pnand %p550_p7, %p544_p11 }
  0x2b   : > { %554 = shalt.err (!%p551_p10)
}
  0x2c   : > { %s640_s28 = smov 64   ;;  %s641_s29 = smov 4  }
  0x2d   : > { %465 = dma.hbm_to_vmem [thread:$0]  (!%p736_p0), %s730_s30, 1024, %s732_s4, %s741_s6, %s640_s28, %s640_s28, %s641_s29  }
  0x2e   : > { %p179_p12 = scmp.lt.s32.totalorder %s637_s14, 3  ;;  %p959_p1 = scmp.ge.s32.totalorder %s637_s14, 1 }
  0x30   : > { %p180_p3 = pnand %p959_p1, %p179_p12 }
  0x31   : > { %s773_s3 = sand.u32 (!%p180_p3), 1, %s621_s10  }
  0x32   : > { %183 = sbr.rel (%p180_p3) target bundleno = 98 (0x62), region = 28  ;;  %s448_s7 = sshll.u32 (!%p180_p3), %s773_s3, 6 }
  0x33   : > { %s186_s8 = scalar_lea.sflag (!%p180_p3), [#allocation3], %s773_s3  ;;  %s779_s15 = scalar_lea.vmem (!%p180_p3), [#allocation2], %s448_s7 }
  0x39   : > { %608 = dma.done.wait (%p708_p8), %s186_s8, 1024  }
  0x3a   : > { %610 = vsyncadd (%p708_p8), %s186_s8, 4294966272  ;;  %p221_p9 = scmp.lt.s32.totalorder %s629_s12, 1  ;;  %v259_v0 = vlaneseq  ;;  %vm295_vm0 = vcmask 125952   ;;  %v231_v4 = vld [vmem:[%s779_s15] sm:$0xf]  ;;  %s457_s21 = sshll.u32 %s629_s12, 10 }
  0x3b   : > { %v642_v6 = vmov 0   ;;  %v232_v8 = vld [vmem:[%s779_s15 + $0x4] sm:$0xf]  ;;  %v233_v12 = vld [vmem:[%s779_s15 + $0x8] sm:$0xf]  ;;  %s815_s18 = scalar_lea.vmem [#allocation5], %s448_s7  ;;  %s882_s26 = scalar_lea.hbm %s952_s2, %s457_s21 }
  0x3c   : > { %s222_s30 = scalar_select %p221_p9, %s629_s12, 1  ;;  %v260_v1 = vshrl.u32 %v259_v0, 7  ;;  %v235_v14 = vld [vmem:[%s779_s15 + $0x10] sm:$0xf]  ;;  %v234_v17 = vld [vmem:[%s779_s15 + $0xc] sm:$0xf] }
  0x3d   : > { %v236_v18 = vld [vmem:[%s779_s15 + $0x14] sm:$0xf]  ;;  %v237_v19 = vld [vmem:[%s779_s15 + $0x18] sm:$0xf]  ;;  %v238_v23 = vld [vmem:[%s779_s15 + $0x1c] sm:$0xf] }
  0x3e   : > { %s450_s4 = sshll.u32 %s222_s30, 2  ;;  %v261_v2 = vsub.s32 0, %v260_v1  ;;  %v239_v24 = vld [vmem:[%s779_s15 + $0x20] sm:$0xf]  ;;  %v240_v29 = vld [vmem:[%s779_s15 + $0x24] sm:$0xf] }
  0x3f   : > { %s227_s16 = scalar_lea.vmem %s951_s1, %s450_s4  ;;  %s331_s19 = sshll.u32 %s815_s18, 4  ;;  %v241_v34 = vld [vmem:[%s779_s15 + $0x28] sm:$0xf]  ;;  %v242_v39 = vld [vmem:[%s779_s15 + $0x2c] sm:$0xf]  ;;  %s886_s19 = int_to_ptr.vmem [resolvable:$true] %s331_s19 }
  0x40   : > { %v247_v3 = vld [vmem:[%s227_s16] sm:$0x1]  ;;  %v248_v5 = vld [vmem:[%s227_s16 + $0x1] sm:$0x1]  ;;  %v249_v9 = vld [vmem:[%s227_s16 + $0x2] sm:$0x1] }
  0x41   : > { %vm251_vm1 = vcmp.gt.f32.partialorder %v247_v3, 0.0  ;;  %vm252_vm2 = vcmp.gt.f32.partialorder %v248_v5, 0.0  ;;  %vm253_vm3 = vcmp.gt.f32.partialorder %v249_v9, 0.0  ;;  %v250_v13 = vld [vmem:[%s227_s16 + $0x3] sm:$0x1]  ;;  %s313_s12 = scalar_lea.sflag [#allocation4], %s773_s3 }
  0x42   : > { %v255_v7 = vsel %vm251_vm1, 1, %v642_v6  ;;  %v256_v11 = vsel %vm252_vm2, 1, %v642_v6  ;;  %v257_v16 = vsel %vm253_vm3, 1, %v642_v6  ;;  %vm254_vm4 = vcmp.gt.f32.partialorder %v250_v13, 0.0  ;;  %v243_v44 = vld [vmem:[%s779_s15 + $0x30] sm:$0xf] }
  0x43   : > { %v262_v10 = vrot.slane %v255_v7, %v261_v2  ;;  %v266_v15 = vrot.slane %v256_v11, %v261_v2  ;;  %v270_v21 = vrot.slane %v257_v16, %v261_v2  ;;  %v258_v22 = vsel %vm254_vm4, 1, %v642_v6  ;;  %v244_v46 = vld [vmem:[%s779_s15 + $0x34] sm:$0xf]  ;;  %v245_v47 = vld [vmem:[%s779_s15 + $0x38] sm:$0xf]  ;;  %s555_s27 = scalar_lea.vmem %s886_s19, 1024 }
  0x44   : > { %v274_v27 = vrot.slane %v258_v22, %v261_v2  ;;  %v246_v50 = vld [vmem:[%s779_s15 + $0x3c] sm:$0xf]  ;;  %p556_p8 = scmp.ne.s32.totalorder %s886_s19, %s555_s27  ;;  %p968_p11 = scmp.ne.s32.totalorder %s956_s22, 0 }
  0x45   : > { %vm798_vm5 = vcmp.eq.s32.totalorder %v262_v10, 1  ;;  %vm806_vm6 = vcmp.eq.s32.totalorder %v266_v15, 1  ;;  %vm822_vm7 = vcmp.eq.s32.totalorder %v270_v21, 1  ;;  %s643_s28 = smov [#allocation5]  }
  0x46   : > { %v279_v25 = vsel %vm798_vm5, %v231_v4, 0.0  ;;  %v283_v28 = vsel %vm798_vm5, %v235_v14, 0.0  ;;  %v280_v30 = vsel %vm806_vm6, %v232_v8, 0.0  ;;  %v284_v32 = vsel %vm806_vm6, %v236_v18, 0.0  ;;  %p557_p0 = pnand %p556_p8, %p968_p11  ;;  %s559_s29 = sshll.u32 %s643_s28, 4  ;;  %s560_s29 = int_to_ptr.vmem [resolvable:$false] %s559_s29 }
  0x47   : > { %296 = vst.msk [vmem:[%s815_s18] sm:$0xf] %vm295_vm0, %v279_v25  ;;  %300 = vst.msk [vmem:[%s815_s18 + $0x10] sm:$0xf] %vm295_vm0, %v283_v28  ;;  %v287_v33 = vsel %vm798_vm5, %v239_v24, 0.0  ;;  %v281_v35 = vsel %vm822_vm7, %v233_v12, 0.0  ;;  %p562_p13 = scmp.lt.s32.totalorder %s886_s19, %s560_s29 }
  0x48   : > { %297 = vst.msk [vmem:[%s815_s18 + $0x4] sm:$0xf] %vm295_vm0, %v280_v30  ;;  %vm837_vm8 = vcmp.eq.s32.totalorder %v274_v27, 1  ;;  %301 = vst.msk [vmem:[%s815_s18 + $0x14] sm:$0xf] %vm295_vm0, %v284_v32  ;;  %v285_v37 = vsel %vm822_vm7, %v237_v19, 0.0  ;;  %p558_p6 = pneg %p557_p0 }
  0x49   : > { %304 = vst.msk [vmem:[%s815_s18 + $0x20] sm:$0xf] %vm295_vm0, %v287_v33  ;;  %v288_v38 = vsel %vm806_vm6, %v240_v29, 0.0  ;;  %298 = vst.msk [vmem:[%s815_s18 + $0x8] sm:$0xf] %vm295_vm0, %v281_v35  ;;  %v282_v40 = vsel %vm837_vm8, %v234_v17, 0.0 }
  0x4a   : > { %302 = vst.msk [vmem:[%s815_s18 + $0x18] sm:$0xf] %vm295_vm0, %v285_v37  ;;  %v286_v41 = vsel %vm837_vm8, %v238_v23, 0.0  ;;  %305 = vst.msk [vmem:[%s815_s18 + $0x24] sm:$0xf] %vm295_vm0, %v288_v38  ;;  %v289_v42 = vsel %vm822_vm7, %v241_v34, 0.0 }
  0x4b   : > { %v290_v43 = vsel %vm837_vm8, %v242_v39, 0.0  ;;  %299 = vst.msk [vmem:[%s815_s18 + $0xc] sm:$0xf] %vm295_vm0, %v282_v40  ;;  %303 = vst.msk [vmem:[%s815_s18 + $0x1c] sm:$0xf] %vm295_vm0, %v286_v41  ;;  %v291_v45 = vsel %vm798_vm5, %v243_v44, 0.0 }
  0x4c   : > { %306 = vst.msk [vmem:[%s815_s18 + $0x28] sm:$0xf] %vm295_vm0, %v289_v42  ;;  %307 = vst.msk [vmem:[%s815_s18 + $0x2c] sm:$0xf] %vm295_vm0, %v290_v43  ;;  %v292_v48 = vsel %vm806_vm6, %v244_v46, 0.0  ;;  %v293_v49 = vsel %vm822_vm7, %v245_v47, 0.0 }
  0x4d   : > { %308 = vst.msk [vmem:[%s815_s18 + $0x30] sm:$0xf] %vm295_vm0, %v291_v45  ;;  %309 = vst.msk [vmem:[%s815_s18 + $0x34] sm:$0xf] %vm295_vm0, %v292_v48  ;;  %v294_v51 = vsel %vm837_vm8, %v246_v50, 0.0  ;;  %s561_s7 = scalar_lea.vmem %s560_s29, 2048 }
  0x4e   : > { %310 = vst.msk [vmem:[%s815_s18 + $0x38] sm:$0xf] %vm295_vm0, %v293_v49  ;;  %311 = vst.msk [vmem:[%s815_s18 + $0x3c] sm:$0xf] %vm295_vm0, %v294_v51  ;;  %p563_p2 = scmp.lt.s32.totalorder %s561_s7, %s555_s27 }
  0x50   : > { %p564_p5 = por %p563_p2, %p562_p13 }
  0x52   : > { %p565_p4 = pnand %p564_p5, %p558_p6 }
  0x54   : > { %568 = shalt.err (!%p565_p4)
}
  0x55   : > { %s569_s8 = scalar_lea.hbm %s882_s26, 1024  ;;  %s573_s4 = scalar_lea.hbm %s952_s2, 2048 }
  0x56   : > { %p570_p7 = scmp.ne.s32.totalorder %s882_s26, %s569_s8  ;;  %p574_p1 = scmp.lt.u32.totalorder %s882_s26, %s952_s2 }
  0x57   : > { %p575_p3 = scmp.lt.u32.totalorder %s573_s4, %s569_s8  ;;  %p577_p8 = scmp.lt.u32.totalorder %s569_s8, %s882_s26 }
  0x58   : > { %p571_p10 = pnand %p570_p7, %p968_p11 }
  0x59   : > { %p576_p9 = por %p575_p3, %p574_p1 }
  0x5a   : > { %p572_p12 = pneg %p571_p10 }
  0x5b   : > { %p578_p0 = por %p577_p8, %p576_p9 }
  0x5d   : > { %p579_p6 = pnand %p578_p0, %p572_p12 }
  0x5f   : > { %582 = shalt.err (!%p579_p6)
}
  0x60   : > { %s644_s16 = smov 64   ;;  %s645_s21 = smov 4  }
  0x61   : > { %460 = dma.vmem_to_hbm [thread:$0]  (%p968_p11), %s886_s19, 1024, %s882_s26, %s313_s12, %s644_s16, %s644_s16, %s645_s21  }
  0x62 PF: > { %s346_s18 = sand.u32 1, %s617_s9   ;;  %p969_p13 = scmp.ne.s32.totalorder %s957_s24, 0 }
  0x63   : > { %p970_p2 = scmp.ge.s32.totalorder %s637_s14, 2  ;;  %s347_s20 = scalar_lea.sflag [#allocation4], %s346_s18 }
  0x65   : > { %p467_p5 = pnand %p970_p2, %p969_p13 }
  0x67   : > { %612 = dma.done.wait (!%p467_p5), %s347_s20, 1024  }
  0x68   : > { %614 = vsyncadd (!%p467_p5), %s347_s20, 4294966272  ;;  %s18_s14 = sadd.s32 1, %s637_s14   ;;  %s971_s9 = smov %s621_s10 }
  0x69   : > { %p15_p4 = scmp.ge.s32.totalorder %s18_s14, 4   ;;  %s972_s10 = smov %s625_s11 }
  0x6a   : > { %s973_s11 = smov %s717_s23  ;;  %s974_s12 = smov %s633_s13 }
  0x6b   : > { %s975_s13 = smov %s977_s17  ;;  %17 = sbr.rel (!%p15_p4) target bundleno = 6 (0x6), region = 76 }
  0x72   :  { %352 = vsyncpa [#allocation3], 1 }
  0x73   :  { %354 = vsyncpa [#allocation3 + $0x1], 1 }
  0x74   :  { %355 = vsyncpa [#allocation4], 1 }
  0x75   :  { %357 = vsyncpa [#allocation4 + $0x1], 1 }

</bundles_post_ra>
